<compile_context>
chip_gen: v7x
topology: tpu7x:2x2x1
jax: 0.10.0
libtpu: 0.0.40
codegen_flags: <defaults>
</compile_context>

<pallas_src>
import functools

import jax
import jax.numpy as jnp
from jax import lax
from jax.experimental import pallas as pl
from jax.experimental.pallas import tpu as pltpu


# ---------------------------------------------------------------------------
# Pallas kernel: fused (concat + 3-layer MLP) for one batch tile
# ---------------------------------------------------------------------------
def _cmid_disc_kernel(inp_ref, cond_ref, w1a_ref, w1b_ref, b1_ref,
                      w2_ref, b2_ref, w3_ref, b3_ref, o_ref):
    cdt = w1a_ref.dtype  # MXU compute dtype (bf16 by default), f32 accumulate

    # Layer 1: concat fused as split-weight dots, then bias + ReLU.
    h = jnp.dot(inp_ref[...].astype(cdt), w1a_ref[...],
                preferred_element_type=jnp.float32)
    h = h + jnp.dot(cond_ref[...].astype(cdt), w1b_ref[...],
                    preferred_element_type=jnp.float32)
    h = jnp.maximum(h + b1_ref[...], 0.0)

    # Layer 2: Linear(H -> H) + ReLU.
    h = jnp.dot(h.astype(w2_ref.dtype), w2_ref[...],
                preferred_element_type=jnp.float32)
    h = jnp.maximum(h + b2_ref[...], 0.0)

    # Output layer H -> 1, lane-dense: contract hidden dim of w3 (1, H) with
    # hidden dim of h (tb, H) -> (1, tb) row; scalar bias read from SMEM.
    row = lax.dot_general(w3_ref[...], h, (((1,), (1,)), ((), ())),
                          preferred_element_type=jnp.float32)      # (1, tb)
    o_ref[0] = (row + b3_ref[0]).astype(o_ref.dtype)               # o_ref: (1,1,tb)


# ---------------------------------------------------------------------------
# Parameter plumbing
# ---------------------------------------------------------------------------
def prepare_params(params, feature_dim, compute_dtype=jnp.bfloat16):
    """Convert torch-layout params to the kernel layout (done once)."""
    w1, b1, w2, b2, w3, b3 = params
    return (w1[:feature_dim].astype(compute_dtype),        # w1a (feat, H)
            w1[feature_dim:].astype(compute_dtype),        # w1b (cond, H)
            b1.reshape(1, -1).astype(jnp.float32),         # (1, H)
            w2.astype(compute_dtype),                      # (H, H)
            b2.reshape(1, -1).astype(jnp.float32),         # (1, H)
            w3.reshape(1, -1).astype(jnp.float32),         # (1, H)  was (H, 1)
            b3.reshape(-1).astype(jnp.float32))            # (1,) scalar -> SMEM


def _pick_batch_tile(batch, block_batch, min_steps=2):
    """Large tile to amortize per-step overhead; >= min_steps steps for big
    batches (v7x megacore + DMA/compute overlap); sublane(8)-aligned unless the
    tile covers the whole batch (full-extent blocks are always legal)."""
    if batch <= 256:
        return batch
    tb = min(block_batch, batch)
    if pl.cdiv(batch, tb) < min_steps:
        tb = pl.cdiv(batch, min_steps)
    return max(8, (tb // 8) * 8)


@functools.partial(jax.jit, static_argnames=("block_batch",))
def cmid_discriminator_forward(inputs, condition, kernel_params, *,
                               block_batch=1024):
    """inputs: (B, feature_dim), condition: (B, action_dim + feature_dim)."""
    w1a, w1b, b1, w2, b2, w3_row, b3 = kernel_params
    batch, feat = inputs.shape
    cond_dim = condition.shape[1]
    hidden = w1a.shape[1]

    tb = _pick_batch_tile(batch, block_batch)
    nblk = pl.cdiv(batch, tb)          # ragged edge block handled by Pallas
    resident = lambda i: (0, 0)        # weights/biases: same block every step

    # Right-sized VMEM budget (double-buffered operand/out tiles + params,
    # generous margin) — stays valid on v7x's 64 MiB part.
    in_bytes = tb * (feat + cond_dim) * inputs.dtype.itemsize
    out_bytes = tb * 4
    param_bytes = sum(int(p.size) * p.dtype.itemsize
                      for p in (w1a, w1b, b1, w2, b2, w3_row, b3))
    vmem_limit = int(min(32 << 20,
                         max(8 << 20,
                             4 * (2 * (in_bytes + out_bytes) + 2 * param_bytes))))

    cost = pl.CostEstimate(
        flops=2 * batch * (feat * hidden + cond_dim * hidden
                           + hidden * hidden + hidden),
        transcendentals=0,
        bytes_accessed=int(batch * (feat + cond_dim) * inputs.dtype.itemsize
                           + batch * 4 + param_bytes))

    out = pl.pallas_call(
        _cmid_disc_kernel,
        out_shape=jax.ShapeDtypeStruct((nblk, 1, tb), jnp.float32),
        grid_spec=pltpu.PrefetchScalarGridSpec(
            num_scalar_prefetch=0,
            grid=(nblk,),
            in_specs=[
                pl.BlockSpec((tb, feat), lambda i: (i, 0)),         # inputs
                pl.BlockSpec((tb, cond_dim), lambda i: (i, 0)),     # condition
                pl.BlockSpec((feat, hidden), resident),             # w1a
                pl.BlockSpec((cond_dim, hidden), resident),         # w1b
                pl.BlockSpec((1, hidden), resident),                # b1
                pl.BlockSpec((hidden, hidden), resident),           # w2
                pl.BlockSpec((1, hidden), resident),                # b2
                pl.BlockSpec((1, hidden), resident),                # w3 row
                pl.BlockSpec(memory_space=pltpu.MemorySpace.SMEM),  # b3 scalar
            ],
            out_specs=pl.BlockSpec((1, 1, tb), lambda i: (i, 0, 0)),
        ),
        compiler_params=pltpu.CompilerParams(
            dimension_semantics=("parallel",),
            vmem_limit_bytes=vmem_limit,
        ),
        cost_estimate=cost,
    )(inputs, condition, w1a, w1b, b1, w2, b2, w3_row, b3)

    # (nblk, 1, tb) lane-dense slab -> (batch, 1). Rows past `batch` in the
    # ragged edge block are garbage from out-of-range reads; rows are
    # independent (no in-kernel cross-row reduce), so we just slice them off.
    return out.reshape(-1)[:batch].reshape(batch, 1)


# ---------------------------------------------------------------------------
# Deterministic synthetic parameters + pure-JAX references
# ---------------------------------------------------------------------------
def make_params(key, in_dim, hidden_dim):
    ks = jax.random.split(key, 6)
    s1 = 1.0 / jnp.sqrt(in_dim)
    s2 = 1.0 / jnp.sqrt(hidden_dim)
    w1 = jax.random.normal(ks[0], (in_dim, hidden_dim), jnp.float32) * s1
    b1 = jax.random.normal(ks[1], (hidden_dim,), jnp.float32) * 0.01
    w2 = jax.random.normal(ks[2], (hidden_dim, hidden_dim), jnp.float32) * s2
    b2 = jax.random.normal(ks[3], (hidden_dim,), jnp.float32) * 0.01
    w3 = jax.random.normal(ks[4], (hidden_dim, 1), jnp.float32) * s2
    b3 = jax.random.normal(ks[5], (1,), jnp.float32) * 0.01
    return (w1, b1, w2, b2, w3, b3)


def reference_forward(inputs, condition, params):
    """Plain f32 module forward (the PyTorch semantics)."""
    w1, b1, w2, b2, w3, b3 = params
    x = jnp.concatenate((inputs, condition), axis=-1)
    h = jnp.maximum(x @ w1 + b1, 0.0)
    h = jnp.maximum(h @ w2 + b2, 0.0)
    return h @ w3 + b3


def reference_forward_quantized(inputs, condition, params,
                                compute_dtype=jnp.bfloat16):
    """Mirrors the kernel dtype path exactly: bf16 MXU operands, f32 accum."""
    w1, b1, w2, b2, w3, b3 = params
    x = jnp.concatenate((inputs, condition), axis=-1).astype(compute_dtype)
    h = jnp.dot(x, w1.astype(compute_dtype), preferred_element_type=jnp.float32)
    h = jnp.maximum(h + b1, 0.0)
    h = jnp.dot(h.astype(compute_dtype), w2.astype(compute_dtype),
                preferred_element_type=jnp.float32)
    h = jnp.maximum(h + b2, 0.0)
    return jnp.sum(h * w3.reshape(1, -1), axis=-1, keepdims=True) + b3


if __name__ == "__main__":
    # Module-consistent shapes:
    #   feature_dim = 32, action_shape = (4,), hidden_dim = 32, hidden_depth = 2
    feature_dim = 32
    action_dim = 4
    hidden_dim = 32
    num_conditional_values = action_dim + feature_dim        # 36
    in_dim = feature_dim + num_conditional_values            # 68

    key = jax.random.PRNGKey(0)
    k_par, k_data = jax.random.split(key)
    params = make_params(k_par, in_dim, hidden_dim)
    kernel_params = prepare_params(params, feature_dim)

    # batch=8   : single full-extent block.
    # batch=512 : 2 x 256 tiles, weights resident across grid steps.
    # batch=1000: ragged batch -> partial edge block, no wrapper jnp.pad.
    for batch in (8, 512, 1000):
        k_in, k_cond, k_data = jax.random.split(k_data, 3)
        inputs = jax.random.normal(k_in, (batch, feature_dim), jnp.float32)
        condition = jax.random.normal(k_cond, (batch, num_conditional_values),
                                      jnp.float32)

        out = jax.block_until_ready(
            cmid_discriminator_forward(inputs, condition, kernel_params))
        assert out.shape == (batch, 1), out.shape

        # Tight check vs a reference that mirrors the kernel's bf16-operand /
        # f32-accumulate path exactly.
        ref_q = reference_forward_quantized(inputs, condition, params)
        assert jnp.allclose(out, ref_q, atol=5e-3, rtol=5e-3), (
            batch, float(jnp.max(jnp.abs(out - ref_q))))

        # Loose semantic check vs the plain f32 module forward (difference is
        # only bf16 operand rounding at hidden=32).
        ref_f32 = reference_forward(inputs, condition, params)
        assert jnp.allclose(out, ref_f32, atol=1e-1, rtol=1e-1), (
            batch, float(jnp.max(jnp.abs(out - ref_f32))))

    print("KERNEL_OK")
</pallas_src>

<mosaic_0001>
module attributes {stable_mosaic.version = 11 : i64} {
  func.func @_cmid_disc_kernel(%arg0: i32, %arg1: memref<8x32xf32, #tpu.memory_space<vmem>>, %arg2: memref<8x36xf32, #tpu.memory_space<vmem>>, %arg3: memref<32x32xbf16, #tpu.memory_space<vmem>>, %arg4: memref<36x32xbf16, #tpu.memory_space<vmem>>, %arg5: memref<1x32xf32, #tpu.memory_space<vmem>>, %arg6: memref<32x32xbf16, #tpu.memory_space<vmem>>, %arg7: memref<1x32xf32, #tpu.memory_space<vmem>>, %arg8: memref<1x32xf32, #tpu.memory_space<vmem>>, %arg9: memref<1xf32, #tpu.memory_space<smem>>, %arg10: memref<1x1x8xf32, #tpu.memory_space<vmem>>) attributes {dimension_semantics = [#tpu.dimension_semantics<parallel>], iteration_bounds = array<i64: 1>, scalar_prefetch = 0 : i64, scratch_operands = 0 : i64, tpu.core_type = #tpu.core_type<tc>, window_params = [{transform_indices = @transform_0, window_bounds = array<i64: 8, 32>}, {transform_indices = @transform_1, window_bounds = array<i64: 8, 36>}, {pipeline_mode = #tpu.pipeline_mode<synchronous>, transform_indices = @transform_2, window_bounds = array<i64: 32, 32>}, {pipeline_mode = #tpu.pipeline_mode<synchronous>, transform_indices = @transform_3, window_bounds = array<i64: 36, 32>}, {pipeline_mode = #tpu.pipeline_mode<synchronous>, transform_indices = @transform_4, window_bounds = array<i64: 1, 32>}, {pipeline_mode = #tpu.pipeline_mode<synchronous>, transform_indices = @transform_5, window_bounds = array<i64: 32, 32>}, {pipeline_mode = #tpu.pipeline_mode<synchronous>, transform_indices = @transform_6, window_bounds = array<i64: 1, 32>}, {pipeline_mode = #tpu.pipeline_mode<synchronous>, transform_indices = @transform_7, window_bounds = array<i64: 1, 32>}, {transform_indices = @transform_8, window_bounds = array<i64: 1>}, {transform_indices = @transform_9, window_bounds = array<i64: 1, 1, 8>}]} {
    %c0 = arith.constant 0 : index
    %c0_0 = arith.constant 0 : index
    %0 = vector.load %arg1[%c0, %c0_0] : memref<8x32xf32, #tpu.memory_space<vmem>>, vector<8x32xf32>
    %1 = arith.truncf %0 : vector<8x32xf32> to vector<8x32xbf16>
    %c0_1 = arith.constant 0 : index
    %c0_2 = arith.constant 0 : index
    %2 = vector.load %arg3[%c0_1, %c0_2] : memref<32x32xbf16, #tpu.memory_space<vmem>>, vector<32x32xbf16>
    %cst = arith.constant dense<0.000000e+00> : vector<8x32xf32>
    %3 = tpu.matmul %1, %2, %cst {dimension_numbers = #tpu.dot_dimension_numbers<[1], [0], [0], [1], [0, 0, 1, 1], [], []>} : vector<8x32xbf16>, vector<32x32xbf16>, vector<8x32xf32> -> vector<8x32xf32>
    %c0_3 = arith.constant 0 : index
    %c0_4 = arith.constant 0 : index
    %4 = vector.load %arg2[%c0_3, %c0_4] : memref<8x36xf32, #tpu.memory_space<vmem>>, vector<8x36xf32>
    %5 = arith.truncf %4 : vector<8x36xf32> to vector<8x36xbf16>
    %c0_5 = arith.constant 0 : index
    %c0_6 = arith.constant 0 : index
    %6 = vector.load %arg4[%c0_5, %c0_6] : memref<36x32xbf16, #tpu.memory_space<vmem>>, vector<36x32xbf16>
    %cst_7 = arith.constant dense<0.000000e+00> : vector<8x32xf32>
    %7 = tpu.matmul %5, %6, %cst_7 {dimension_numbers = #tpu.dot_dimension_numbers<[1], [0], [0], [1], [0, 0, 1, 1], [], []>} : vector<8x36xbf16>, vector<36x32xbf16>, vector<8x32xf32> -> vector<8x32xf32>
    %8 = arith.addf %3, %7 : vector<8x32xf32>
    %c0_8 = arith.constant 0 : index
    %c0_9 = arith.constant 0 : index
    %9 = vector.load %arg5[%c0_8, %c0_9] : memref<1x32xf32, #tpu.memory_space<vmem>>, vector<1x32xf32>
    %10 = vector.broadcast %9 : vector<1x32xf32> to vector<8x32xf32>
    %11 = arith.addf %8, %10 : vector<8x32xf32>
    %cst_10 = arith.constant 0.000000e+00 : f32
    %12 = vector.broadcast %cst_10 : f32 to vector<8x32xf32>
    %13 = arith.maximumf %11, %12 : vector<8x32xf32>
    %14 = arith.truncf %13 : vector<8x32xf32> to vector<8x32xbf16>
    %c0_11 = arith.constant 0 : index
    %c0_12 = arith.constant 0 : index
    %15 = vector.load %arg6[%c0_11, %c0_12] : memref<32x32xbf16, #tpu.memory_space<vmem>>, vector<32x32xbf16>
    %cst_13 = arith.constant dense<0.000000e+00> : vector<8x32xf32>
    %16 = tpu.matmul %14, %15, %cst_13 {dimension_numbers = #tpu.dot_dimension_numbers<[1], [0], [0], [1], [0, 0, 1, 1], [], []>} : vector<8x32xbf16>, vector<32x32xbf16>, vector<8x32xf32> -> vector<8x32xf32>
    %c0_14 = arith.constant 0 : index
    %c0_15 = arith.constant 0 : index
    %17 = vector.load %arg7[%c0_14, %c0_15] : memref<1x32xf32, #tpu.memory_space<vmem>>, vector<1x32xf32>
    %18 = vector.broadcast %17 : vector<1x32xf32> to vector<8x32xf32>
    %19 = arith.addf %16, %18 : vector<8x32xf32>
    %cst_16 = arith.constant 0.000000e+00 : f32
    %20 = vector.broadcast %cst_16 : f32 to vector<8x32xf32>
    %21 = arith.maximumf %19, %20 : vector<8x32xf32>
    %c0_17 = arith.constant 0 : index
    %c0_18 = arith.constant 0 : index
    %22 = vector.load %arg8[%c0_17, %c0_18] : memref<1x32xf32, #tpu.memory_space<vmem>>, vector<1x32xf32>
    %cst_19 = arith.constant dense<0.000000e+00> : vector<1x8xf32>
    %23 = tpu.matmul %22, %21, %cst_19 {dimension_numbers = #tpu.dot_dimension_numbers<[1], [1], [0], [0], [0, 0, 1, 0], [], []>} : vector<1x32xf32>, vector<8x32xf32>, vector<1x8xf32> -> vector<1x8xf32>
    %c0_20 = arith.constant 0 : index
    %24 = memref.load %arg9[%c0_20] : memref<1xf32, #tpu.memory_space<smem>>
    %25 = vector.broadcast %24 : f32 to vector<1x8xf32>
    %26 = arith.addf %23, %25 : vector<1x8xf32>
    %c0_21 = arith.constant 0 : index
    %c0_22 = arith.constant 0 : index
    %c0_23 = arith.constant 0 : index
    %27 = vector.load %arg10[%c0_21, %c0_22, %c0_23] : memref<1x1x8xf32, #tpu.memory_space<vmem>>, vector<1x1x8xf32>
    %28 = vector.shape_cast %27 : vector<1x1x8xf32> to vector<1x8xf32>
    %29 = vector.shape_cast %26 : vector<1x8xf32> to vector<1x1x8xf32>
    tpu.vector_store %arg10[%c0_21, %c0_22, %c0_23], %29 {strides = array<i32>} : memref<1x1x8xf32, #tpu.memory_space<vmem>>, vector<1x1x8xf32>,
    return
  }
  func.func @transform_0(%arg0: i32) -> (i32, i32) {
    %c0_i32 = arith.constant 0 : i32
    %c0_i32_0 = arith.constant 0 : i32
    return %arg0, %c0_i32 : i32, i32
  }
  func.func @transform_1(%arg0: i32) -> (i32, i32) {
    %c0_i32 = arith.constant 0 : i32
    %c0_i32_0 = arith.constant 0 : i32
    return %arg0, %c0_i32 : i32, i32
  }
  func.func @transform_2(%arg0: i32) -> (i32, i32) {
    %c0_i32 = arith.constant 0 : i32
    %c0_i32_0 = arith.constant 0 : i32
    %c0_i32_1 = arith.constant 0 : i32
    return %c0_i32, %c0_i32_0 : i32, i32
  }
  func.func @transform_3(%arg0: i32) -> (i32, i32) {
    %c0_i32 = arith.constant 0 : i32
    %c0_i32_0 = arith.constant 0 : i32
    %c0_i32_1 = arith.constant 0 : i32
    return %c0_i32, %c0_i32_0 : i32, i32
  }
  func.func @transform_4(%arg0: i32) -> (i32, i32) {
    %c0_i32 = arith.constant 0 : i32
    %c0_i32_0 = arith.constant 0 : i32
    %c0_i32_1 = arith.constant 0 : i32
    return %c0_i32, %c0_i32_0 : i32, i32
  }
  func.func @transform_5(%arg0: i32) -> (i32, i32) {
    %c0_i32 = arith.constant 0 : i32
    %c0_i32_0 = arith.constant 0 : i32
    %c0_i32_1 = arith.constant 0 : i32
    return %c0_i32, %c0_i32_0 : i32, i32
  }
  func.func @transform_6(%arg0: i32) -> (i32, i32) {
    %c0_i32 = arith.constant 0 : i32
    %c0_i32_0 = arith.constant 0 : i32
    %c0_i32_1 = arith.constant 0 : i32
    return %c0_i32, %c0_i32_0 : i32, i32
  }
  func.func @transform_7(%arg0: i32) -> (i32, i32) {
    %c0_i32 = arith.constant 0 : i32
    %c0_i32_0 = arith.constant 0 : i32
    %c0_i32_1 = arith.constant 0 : i32
    return %c0_i32, %c0_i32_0 : i32, i32
  }
  func.func @transform_8(%arg0: i32) -> i32 {
    %c0_i32 = arith.constant 0 : i32
    %c0_i32_0 = arith.constant 0 : i32
    return %c0_i32 : i32
  }
  func.func @transform_9(%arg0: i32) -> (i32, i32, i32) {
    %c0_i32 = arith.constant 0 : i32
    %c0_i32_0 = arith.constant 0 : i32
    %c0_i32_1 = arith.constant 0 : i32
    return %arg0, %c0_i32, %c0_i32_0 : i32, i32, i32
  }
}

</mosaic_0001>

<bundles_post_ra>
// kernel: cmid_discriminator_forward.1
= control target key start
LH: loop header
LB: loop body
LE: loop exit
PB: predicated region body
PF: predicated region fallthrough
CT: control target
= control target key end

     0   :  { %15 = vsyncpa [#allocation4], 0  ;;  %s590_s0 = inlined_call_operand.hbm [shape: f32[8,32], index: 0, kind: input, shape index: {}]   ;;  %s591_s1 = inlined_call_operand.vmem [shape: f32[8,36], index: 1, kind: input, shape index: {}]   ;;  %s592_s2 = inlined_call_operand.vmem [shape: bf16[32,32], index: 2, kind: input, shape index: {}]   ;;  %s593_s3 = inlined_call_operand.vmem [shape: bf16[36,32], index: 3, kind: input, shape index: {}]   ;;  %s594_s4 = inlined_call_operand.vmem [shape: f32[1,32], index: 4, kind: input, shape index: {}]   ;;  %s595_s5 = inlined_call_operand.vmem [shape: bf16[32,32], index: 5, kind: input, shape index: {}]   ;;  %s596_s6 = inlined_call_operand.vmem [shape: f32[1,32], index: 6, kind: input, shape index: {}]   ;;  %s597_s7 = inlined_call_operand.vmem [shape: f32[1,32], index: 7, kind: input, shape index: {}]   ;;  %s598_s8 = inlined_call_operand.<no memory space> [shape: f32[1], index: 8, kind: input, shape index: {}]   ;;  %s599_s9 = inlined_call_operand.hbm [shape: f32[1,1,8], index: 9, kind: output, shape index: {}]  }
   0x1   :  { %16 = vsyncpa [#allocation5], 0  ;;  %s468_s30 = smov [#allocation3]   ;;  %s420_s13 = scalar_lea.hbm %s590_s0, 128 }
   0x2   :  { %s23_s10 = sshll.u32 %s468_s30, 4  ;;  %p421_p0 = scmp.ne.s32.totalorder %s590_s0, %s420_s13  ;;  %s24_s10 = int_to_ptr.vmem [resolvable:$true] %s23_s10 }
   0x3   :  { %p424_p1 = scmp.lt.u32.totalorder %s420_s13, %s590_s0 }
   0x5   :  { %p426_p2 = pnand %p424_p1, %p421_p0 }
   0x7   :  { %429 = shalt.err (!%p426_p2)
}
   0x8   :  { %s430_s18 = scalar_lea.vmem %s24_s10, 128  ;;  %p435_p4 = scmp.lt.s32.totalorder %s24_s10, %s24_s10 }
   0x9   :  { %p431_p3 = scmp.ne.s32.totalorder %s24_s10, %s430_s18  ;;  %p436_p5 = scmp.lt.s32.totalorder %s430_s18, %s430_s18 }
   0xb   :  { %p437_p6 = por %p436_p5, %p435_p4 }
   0xd   :  { %p438_p7 = pnand %p437_p6, %p431_p3 }
   0xf   :  { %441 = shalt.err (!%p438_p7)
}
  0x10   :  { %26 = dma.hbm_to_vmem [thread:$0]  %s590_s0, 128, %s24_s10, [#allocation4]  }
  0x11   :  { %464 = dma.done.wait [#allocation4], 128  }
  0x12   :  { %465 = vsyncadd [#allocation4], 4294967168  ;;  %v469_v0 = vmov 0.0   ;;  %vm470_vm0 = vmmov 0   ;;  %v413_v1 = vld [vmem:[%s593_s3] sm:$0xff]   ;;  %v415_v3 = vld [vmem:[%s593_s3 + $0x8] sm:$0xff]   ;;  %v258_v34 = vstv %s598_s8 }
  0x13   :  { %378 = vmatprep.subr.bf16.mxu0 %v469_v0  ;;  %388 = vmatprep.subr.bf16.mxu1 %v469_v0  ;;  %v414_v2 = vld [vmem:[%s592_s2] sm:$0xff]   ;;  %v416_v4 = vld [vmem:[%s592_s2 + $0x8] sm:$0xff]   ;;  %vm79_vm1 = vcmask 1041408   ;;  %v417_v5 = vld [vmem:[%s593_s3 + $0x10] ss:$0 sps:$4 sm:$0x33]  }
  0x14   :  { %392 = vmatprep.mubr.msk.bf16.mxu1 %vm470_vm0, %v469_v0  ;;  %384 = vmatprep.mubr.msk.bf16.mxu0 %vm470_vm0, %v469_v0  ;;  %v47_v6 = vld [vmem:[#allocation3] sm:$0xff]  ;;  %v81_v9 = vsel %vm79_vm1, %v417_v5, 0  ;;  %vm135_vm2 = vcmask 261120   ;;  %vm75_vm3 = vcmask 293888   ;;  %v419_v12 = vld [vmem:[%s595_s5 + $0x8] sm:$0xff]   ;;  %s471_s18 = smov [#allocation6]  }
  0x15   :  { %379 = vmatpush3.bf16.msra.mxu0 %v413_v1  ;;  %389 = vmatpush3.bf16.msra.mxu1 %v414_v2  ;;  %v48_v7 = vpack.c.bf16 %v47_v6, %v47_v6  ;;  %v53_v8 = vld [vmem:[%s591_s1] sm:$0xff]  ;;  %vm335_vm4 = vcmask 57344  }
  0x16   :  { %380 = vmatprep.subr.bf16.mxu0 %v469_v0  ;;  %390 = vmatprep.subr.bf16.mxu1 %v469_v0  ;;  %v54_v10 = vpack.c.bf16 %v53_v8, %v53_v8  ;;  %v418_v11 = vld [vmem:[%s595_s5] sm:$0xff]  }
  0x17   :  { %v359_v17 = vld [vmem:[%s594_s4] ss:$0 sm:$0xff] }
  0x18   :  { %v360_v26 = vld [vmem:[%s596_s6] ss:$0 sm:$0xff]  ;;  %s343_s6 = sshll.u32 %s471_s18, 4  ;;  %s344_s6 = int_to_ptr.vmem [resolvable:$true] %s343_s6 }
  0x19   :  { %381 = vmatpush3.bf16.msra.mxu0 %v415_v3  ;;  %391 = vmatpush3.bf16.msra.mxu1 %v416_v4  ;;  %v256_v33 = vld [vmem:[%s597_s7] sm:$0x1]  ;;  %s442_s19 = scalar_lea.vmem %s344_s6, 16  ;;  %s446_s20 = scalar_lea.vmem %s344_s6, 32 }
  0x1a   :  { %382 = vmatprep.subr.bf16.mxu0 %v469_v0  ;;  %396 = vmatprep.subr.bf16.mxu1 %v469_v0  ;;  %p443_p8 = scmp.ne.s32.totalorder %s344_s6, %s442_s19  ;;  %p447_p9 = scmp.lt.s32.totalorder %s344_s6, %s344_s6 }
  0x1b   :  { %p448_p10 = scmp.lt.s32.totalorder %s446_s20, %s442_s19 }
  0x1c   :  { %393 = vmatmul.mubr.msk.bf16.vlgmr.msra.gmra.mrb[0].mxu1 %vm135_vm2, %v48_v7 }
  0x1d   :  { %383 = vmatpush3.bf16.msra.mxu0 %v81_v9  ;;  %400 = vmatprep.mubr.msk.bf16.mxu1 %vm470_vm0, %v469_v0  ;;  %p449_p11 = por %p448_p10, %p447_p9 }
  0x1e   :  { %404 = vmatprep.subr.mxu0 %v469_v0  ;;  %397 = vmatpush3.bf16.msra.mxu1 %v418_v11 }
  0x1f   :  { %398 = vmatprep.subr.bf16.mxu1 %v469_v0  ;;  %p450_p12 = pnand %p449_p11, %p443_p8 }
  0x20   :  { %385 = vmatmul.mubr.msk.bf16.vlgmr.msra.gmra.mrb[0].mxu0 %vm75_vm3, %v54_v10 }
  0x21   :  { %406 = vmatprep.mubr.msk.f32.mxu0 %vm470_vm0, %v469_v0 }
  0x22   :  { %399 = vmatpush3.bf16.msra.mxu1 %v419_v12 }
  0xef   :  { %v173_v13 = vpop.f32.mrb[0].mxu1 }
  0xf0   :  { %v394_v14 = vpop.f32.mrb[1].mxu1 }
  0xf1   :  { %v176_v15 = vpop.f32.mrb[2].mxu1 }
  0xf2   :  { %v395_v18 = vpop.f32.mrb[3].mxu1 }
  0xf3   :  { %v117_v16 = vpop.f32.mrb[0].mxu0 }
  0xf4   :  { %v174_v19 = vadd.f32 %v173_v13, %v117_v16  ;;  %v386_v20 = vpop.f32.mrb[1].mxu0 }
  0xf5   :  { %v120_v21 = vpop.f32.mrb[2].mxu0 }
  0xf6   :  { %v186_v22 = vadd.f32 %v359_v17, %v174_v19  ;;  %v387_v23 = vpop.f32.mrb[3].mxu0 }
  0xf8   :  { %v187_v24 = vmax.f32 %v186_v22, 0.0 }
  0xfa   :  { %v188_v25 = vpack.c.bf16 %v187_v24, %v187_v24 }
  0xfc   :  { %401 = vmatmul.mubr.msk.bf16.vlgmr.msra.gmra.mrb[4].mxu1 %vm135_vm2, %v188_v25 }
 0x1cf   :  { %v249_v27 = vpop.f32.mrb[4].mxu1 }
 0x1d0   :  { %v250_v28 = vadd.f32 %v360_v26, %v249_v27  ;;  %v402_v29 = vpop.f32.mrb[5].mxu1 }
 0x1d1   :  { %v252_v30 = vpop.f32.mrb[6].mxu1 }
 0x1d2   :  { %v255_v31 = vmax.f32 %v250_v28, 0.0  ;;  %v403_v32 = vpop.f32.mrb[7].mxu1 }
 0x1d4   :  { %405 = vmatpush3.xpose.msk.msra.mxu0 %vm135_vm2, %v255_v31 }
 0x1d7   :  { %407 = vmatmul.mubr.msk.f32.vlgmr.msra.gmra.mrb[4].mxu0 %vm135_vm2, %v256_v33 }
 0x2aa   :  { %v331_v35 = vpop.f32.mrb[4].mxu0 }
 0x2ab   :  { %v332_v36 = vadd.f32 %v331_v35, %v258_v34  ;;  %v408_v37 = vpop.f32.mrb[5].mxu0 }
 0x2ad   :  { %336 = vst.msk [vmem:[#allocation6] sm:$0x1] %vm335_vm4, %v332_v36 }
 0x2ae   :  { %453 = shalt.err (!%p450_p12)
}
 0x2af   :  { %s454_s8 = scalar_lea.hbm %s599_s9, 16 }
 0x2b0   :  { %p455_p13 = scmp.ne.s32.totalorder %s599_s9, %s454_s8  ;;  %p458_p0 = scmp.lt.u32.totalorder %s454_s8, %s599_s9 }
 0x2b2   :  { %p460_p1 = pnand %p458_p0, %p455_p13 }
 0x2b4   :  { %463 = shalt.err (!%p460_p1)
}
 0x2b5   :  { %346 = dma.vmem_to_hbm [thread:$0]  %s344_s6, 16, %s599_s9, [#allocation5]  }
 0x2b6   :  { %466 = dma.done.wait [#allocation5], 16  }
 0x2b7   :  { %467 = vsyncadd [#allocation5], 4294967280 }
 0x2b8   :  { %350 = vsyncpa [#allocation4], 1 }
 0x2b9   :  { %351 = vsyncpa [#allocation5], 1 }

</bundles_post_ra>
